<compile_context>
chip_gen: v5e
topology: v5e:2x2
jax: 0.10.0
libtpu: 0.0.40
codegen_flags: <defaults>
</compile_context>

<pallas_src>
import jax
import jax.numpy as jnp
from jax.experimental import pallas as pl
from jax.experimental.pallas import tpu as pltpu


TARGET_TILE_BYTES = 4 * 1024 * 1024    # ~4 MiB per input tile
VMEM_LIMIT_BYTES = 32 * 1024 * 1024    # covers in+out double-buffering on all chips
PAD_LANE = 1024                        # lane width for the (rare) pad fallback path


def slu_kernel(k_ref, x_ref, o_ref):
    # k_ref: (1,) scalar parameter in SMEM
    # x_ref / o_ref: (tile_rows, lane) VMEM tiles
    x = x_ref[...]
    k = k_ref[0]
    a = jnp.log1p(jnp.abs(x))          # A = log(1 + |x|)  (EUP transcendental)
    b = k * (a * a)                    # B = k * A^2       (VPU)
    o_ref[...] = jnp.where(x > 0, x + b, b - a)


def _round_up(v, m):
    return (v + m - 1) // m * m


def _choose_lane(total):
    """Widest lane width (multiple of 128) that divides total, else None."""
    for lane in (8192, 4096, 2048, 1024, 512, 256, 128):
        if total % lane == 0:
            return lane
    return None


def _choose_tile_rows(rows, lane, itemsize):
    """Tile row count: ~TARGET_TILE_BYTES per tile, multiple of 8, and >=2 grid
    steps whenever possible so v7x's two TensorCores both get work."""
    if rows <= 8:
        return rows                                   # single full-extent block
    max_rows = max(8, (TARGET_TILE_BYTES // (lane * itemsize)) // 8 * 8)
    num_blocks = max(2, pl.cdiv(rows, max_rows))      # >=2 steps for megacore
    return _round_up(pl.cdiv(rows, num_blocks), 8)


def _slu_2d(x2d, k):
    rows, lane = x2d.shape
    tile_rows = _choose_tile_rows(rows, lane, x2d.dtype.itemsize)
    grid = pl.cdiv(rows, tile_rows)                   # ragged last block is masked
    total = rows * lane
    return pl.pallas_call(
        slu_kernel,
        out_shape=jax.ShapeDtypeStruct((rows, lane), x2d.dtype),
        grid=(grid,),
        in_specs=[
            pl.BlockSpec(memory_space=pltpu.SMEM),              # k (scalar param)
            pl.BlockSpec((tile_rows, lane), lambda i: (i, 0)),  # x tile
        ],
        out_specs=pl.BlockSpec((tile_rows, lane), lambda i: (i, 0)),
        compiler_params=pltpu.CompilerParams(
            dimension_semantics=("parallel",),        # shard rows across v7x's 2 TCs
            vmem_limit_bytes=VMEM_LIMIT_BYTES,
        ),
        cost_estimate=pl.CostEstimate(
            flops=5 * total,
            transcendentals=total,
            bytes_accessed=2 * total * x2d.dtype.itemsize,
        ),
    )(k, x2d)


def slu(x: jax.Array, k: jax.Array) -> jax.Array:
    """x: any-shape float array (e.g. NCHW).  k: (1,) float (num_parameters=1)."""
    # TODO(synk): per-channel k (num_parameters > 1) would need a channel-indexed
    # lookup; the flattened lane-dense layout below discards channel identity.
    assert k.size == 1, "only num_parameters=1 is supported by this kernel"
    orig_shape = x.shape
    total = x.size

    lane = _choose_lane(total)
    if lane is not None:
        # Free bitcast reshape of the contiguous tensor: no pad / no slice,
        # no extra HBM passes.
        out2d = _slu_2d(x.reshape(total // lane, lane), k)
        return out2d.reshape(orig_shape)

    # Awkward element count (not a multiple of 128): flatten + zero-pad.
    # SLU(0) == 0, so zero padding is numerically inert.
    padded_total = _round_up(total, PAD_LANE)
    x_flat = jnp.pad(x.reshape(-1), (0, padded_total - total))
    out2d = _slu_2d(x_flat.reshape(padded_total // PAD_LANE, PAD_LANE), k)
    return out2d.reshape(-1)[:total].reshape(orig_shape)


def slu_reference(x, k):
    a = jnp.log1p(jnp.abs(x))
    b = k.reshape(()) * a * a
    return jnp.where(x > 0, x + b, b - a)


if __name__ == "__main__":
    key = jax.random.PRNGKey(0)

    # Parameter init matches nn.Parameter(torch.full((num_parameters,), 0.0)),
    # but also use a nonzero value so the B term is actually exercised.
    k_zero = jnp.full((1,), 0.0, dtype=jnp.float32)
    k_val = jnp.full((1,), 0.7, dtype=jnp.float32)

    # Primary check: the module's implied small NCHW shape (no-pad bitcast path).
    N, C, H, W = 2, 4, 16, 16
    x = jax.random.normal(key, (N, C, H, W), dtype=jnp.float32)
    for kk in (k_zero, k_val):
        y = jax.block_until_ready(slu(x, kk))
        y_ref = slu_reference(x, kk)
        assert y.shape == x.shape and y.dtype == x.dtype
        assert jnp.allclose(y, y_ref, atol=1e-6, rtol=1e-6), "mismatch vs reference"

    # Check 2: shape whose size is a multiple of 128 but gives a ragged last
    # block and a multi-step parallel grid (exercises the masked-write path).
    x2 = jax.random.normal(jax.random.PRNGKey(1), (2, 3, 40, 128), dtype=jnp.float32)
    y2 = jax.block_until_ready(slu(x2, k_val))
    assert jnp.allclose(y2, slu_reference(x2, k_val), atol=1e-6, rtol=1e-6), \
        "mismatch vs reference (ragged)"

    # Check 3: awkward shape that exercises the flatten+pad fallback path.
    x3 = jax.random.normal(jax.random.PRNGKey(2), (3, 5, 17, 23), dtype=jnp.float32)
    y3 = jax.block_until_ready(slu(x3, k_val))
    assert y3.shape == x3.shape
    assert jnp.allclose(y3, slu_reference(x3, k_val), atol=1e-6, rtol=1e-6), \
        "mismatch vs reference (padded)"

    print("KERNEL_OK")
</pallas_src>

<mosaic_0001>
module attributes {stable_mosaic.version = 11 : i64} {
  func.func @slu_kernel(%arg0: i32, %arg1: memref<1xf32, #tpu.memory_space<smem>>, %arg2: memref<1x2048xf32, #tpu.memory_space<vmem>>, %arg3: memref<1x2048xf32, #tpu.memory_space<vmem>>) attributes {dimension_semantics = [#tpu.dimension_semantics<parallel>], iteration_bounds = array<i64: 1>, scalar_prefetch = 0 : i64, scratch_operands = 0 : i64, tpu.core_type = #tpu.core_type<tc>, window_params = [{transform_indices = @transform_0, window_bounds = array<i64: 1>}, {transform_indices = @transform_1, window_bounds = array<i64: 1, 2048>}, {transform_indices = @transform_2, window_bounds = array<i64: 1, 2048>}]} {
    %c0 = arith.constant 0 : index
    %c0_0 = arith.constant 0 : index
    %0 = vector.load %arg2[%c0, %c0_0] : memref<1x2048xf32, #tpu.memory_space<vmem>>, vector<1x2048xf32>
    %c0_1 = arith.constant 0 : index
    %1 = memref.load %arg1[%c0_1] : memref<1xf32, #tpu.memory_space<smem>>
    %2 = math.absf %0 : vector<1x2048xf32>
    %3 = math.log1p %2 : vector<1x2048xf32>
    %4 = arith.mulf %3, %3 : vector<1x2048xf32>
    %5 = vector.broadcast %1 : f32 to vector<1x2048xf32>
    %6 = arith.mulf %5, %4 : vector<1x2048xf32>
    %cst = arith.constant 0.000000e+00 : f32
    %7 = vector.broadcast %cst : f32 to vector<1x2048xf32>
    %8 = arith.cmpf ogt, %0, %7 : vector<1x2048xf32>
    %9 = arith.addf %0, %6 : vector<1x2048xf32>
    %10 = arith.subf %6, %3 : vector<1x2048xf32>
    %11 = arith.select %8, %9, %10 : vector<1x2048xi1>, vector<1x2048xf32>
    %c0_2 = arith.constant 0 : index
    %c0_3 = arith.constant 0 : index
    %12 = vector.load %arg3[%c0_2, %c0_3] : memref<1x2048xf32, #tpu.memory_space<vmem>>, vector<1x2048xf32>
    tpu.vector_store %arg3[%c0_2, %c0_3], %11 {strides = array<i32>} : memref<1x2048xf32, #tpu.memory_space<vmem>>, vector<1x2048xf32>,
    return
  }
  func.func @transform_0(%arg0: i32) -> i32 {
    %c0_i32 = arith.constant 0 : i32
    %c0_i32_0 = arith.constant 0 : i32
    return %c0_i32 : i32
  }
  func.func @transform_1(%arg0: i32) -> (i32, i32) {
    %c0_i32 = arith.constant 0 : i32
    %c0_i32_0 = arith.constant 0 : i32
    return %arg0, %c0_i32 : i32, i32
  }
  func.func @transform_2(%arg0: i32) -> (i32, i32) {
    %c0_i32 = arith.constant 0 : i32
    %c0_i32_0 = arith.constant 0 : i32
    return %arg0, %c0_i32 : i32, i32
  }
}

</mosaic_0001>

<bundles_post_ra>
// kernel: tpu_custom_call.1
= control target key start
LH: loop header
LB: loop body
LE: loop exit
PB: predicated region body
PF: predicated region fallthrough
CT: control target
= control target key end

     0   :  { %8 = vsyncpa [#allocation4], 0  ;;  %s166_s0 = inlined_call_operand.<no memory space> [shape: f32[1], index: 0, kind: input, shape index: {}]   ;;  %s167_s1 = inlined_call_operand.hbm [shape: f32[1,2048], index: 1, kind: input, shape index: {}]   ;;  %s168_s2 = inlined_call_operand.hbm [shape: f32[1,2048], index: 2, kind: output, shape index: {}]  }
   0x1   :  { %9 = vsyncpa [#allocation5], 0  ;;  %s17_s11 = sshll.u32 %s167_s1, 4  ;;  %s140_s12 = smov [#allocation3]   ;;  %s18_s11 = int_to_ptr.hbm [resolvable:$true] %s17_s11 }
   0x2   :  { %s19_s13 = sshll.u32 %s140_s12, 4  ;;  %s20_s13 = int_to_ptr.vmem [resolvable:$true] %s19_s13 }
   0x3   :  { %22 = dma.hbm_to_vmem [thread:$0]  %s18_s11, 256, %s20_s13, [#allocation4]  }
   0x4   :  { %136 = dma.done.wait [#allocation4], 256  }
   0x5   :  { %137 = vsyncadd [#allocation4], 4294967040  ;;  %v27_v0 = vld [vmem:[#allocation3] sm:$0xff]  ;;  %v28_v1 = vld [vmem:[#allocation3 + $0x8] sm:$0xff]  ;;  %v52_v17 = vstv %s166_s0  ;;  %s141_s15 = smov [#allocation6]   ;;  %s72_s19 = sshll.u32 %s168_s2, 4  ;;  %s73_s19 = int_to_ptr.hbm [resolvable:$true] %s72_s19 }
   0x6   :  { %v30_v2 = vand.u32 2147483647, %v27_v0  ;;  %v31_v3 = vand.u32 2147483647, %v28_v1  ;;  %vm55_vm2 = vcmp.gt.f32.partialorder %v27_v0, 0.0  ;;  %s70_s16 = sshll.u32 %s141_s15, 4  ;;  %s71_s16 = int_to_ptr.vmem [resolvable:$true] %s70_s16 }
   0x7   :  { %vm56_vm3 = vcmp.gt.f32.partialorder %v28_v1, 0.0 }
   0x8   :  { %v32_v4 = vadd.f32 1.0, %v30_v2  ;;  %v35_v5 = vmul.f32 -0.5, %v30_v2  ;;  %v41_v6 = vadd.f32 1.0, %v31_v3  ;;  %v44_v7 = vmul.f32 -0.5, %v31_v3 }
   0x9   :  { %vm39_vm0 = vcmp.lt.f32.partialorder %v30_v2, 0.0004427343  ;;  %vm48_vm1 = vcmp.lt.f32.partialorder %v31_v3, 0.0004427343 }
   0xa   :  { %84 = vlog2.f32 %v32_v4  ;;  %v36_v8 = vadd.f32 1.0, %v35_v5  ;;  %v45_v9 = vadd.f32 1.0, %v44_v7 }
   0xb   :  { %86 = vlog2.f32 %v41_v6 }
   0xc   :  { %v37_v10 = vmul.f32 %v36_v8, %v30_v2  ;;  %v46_v12 = vmul.f32 %v45_v9, %v31_v3 }
  0x10   :  { %v85_v11 = vpop.eup %84 }
  0x11   :  { %v87_v13 = vpop.eup %86  ;;  %v34_v14 = vmul.f32 0.6931472, %v85_v11 }
  0x12   :  { %v43_v15 = vmul.f32 0.6931472, %v87_v13 }
  0x13   :  { %v40_v16 = vsel %vm39_vm0, %v37_v10, %v34_v14 }
  0x14   :  { %v50_v18 = vmul.f32 %v40_v16, %v40_v16  ;;  %v49_v19 = vsel %vm48_vm1, %v46_v12, %v43_v15 }
  0x15   :  { %v51_v20 = vmul.f32 %v49_v19, %v49_v19 }
  0x16   :  { %v53_v21 = vmul.f32 %v52_v17, %v50_v18 }
  0x17   :  { %v54_v22 = vmul.f32 %v52_v17, %v51_v20 }
  0x18   :  { %v57_v23 = vadd.f32 %v53_v21, %v27_v0  ;;  %v59_v24 = vsub.f32 %v53_v21, %v40_v16 }
  0x19   :  { %v58_v25 = vadd.f32 %v54_v22, %v28_v1  ;;  %v60_v26 = vsub.f32 %v54_v22, %v49_v19 }
  0x1a   :  { %v61_v27 = vsel %vm55_vm2, %v57_v23, %v59_v24 }
  0x1b   :  { %63 = vst [vmem:[#allocation6] sm:$0xff] %v61_v27  ;;  %v62_v28 = vsel %vm56_vm3, %v58_v25, %v60_v26 }
  0x1c   :  { %64 = vst [vmem:[#allocation6 + $0x8] sm:$0xff] %v62_v28 }
  0x1d   :  { %75 = dma.vmem_to_hbm [thread:$0]  %s71_s16, 256, %s73_s19, [#allocation5]  }
  0x1e   :  { %138 = dma.done.wait [#allocation5], 256  }
  0x1f   :  { %139 = vsyncadd [#allocation5], 4294967040 }
  0x20   :  { %80 = vsyncpa [#allocation4], 1 }
  0x21   :  { %81 = vsyncpa [#allocation5], 1 }

</bundles_post_ra>
